<compile_context>
chip_gen: v6e
topology: v6e:2x2x1
jax: 0.10.0
libtpu: 0.0.40
codegen_flags: <defaults>
</compile_context>

<pallas_src>
import functools

import jax
import jax.numpy as jnp
from jax.experimental import pallas as pl
from jax.experimental.pallas import tpu as pltpu

IN_DIM = 17 * 27       # 459 (fed un-padded; Mosaic masks the K remainder)
HID = 512
OUT_DIM = 6
OUT_PAD = 128          # lane-dense output stores; wrapper slices back to 6
NEG_SLOPE = 0.01       # torch default for nn.LeakyReLU()
DEFAULT_TB = 512       # target batch tile (rows)


def _round_up(n, m):
    return ((n + m - 1) // m) * m


def _cdiv(a, b):
    return (a + b - 1) // b


def _leaky_relu(x):
    # max(x, a*x) == LeakyReLU(a) for 0 < a < 1: one mul + one max per element.
    return jnp.maximum(x, NEG_SLOPE * x)


def _default_act_dtype():
    """bf16 bias-add/activation on chips with bf16 VPUs (v6e/Trillium, v7x);
    f32 elsewhere (v5e and older have no bf16 VALU -- bf16 would decompose)."""
    try:
        kind = jax.devices()[0].device_kind.lower()
    except Exception:
        return jnp.float32
    if any(tag in kind for tag in ("v6", "trillium", "v7", "tpu7")):
        return jnp.bfloat16
    return jnp.float32


def _batch_tiling(batch):
    """Balanced batch tiles: <= DEFAULT_TB rows/tile, rounded to the sublane
    (8), and >= 2 tiles once the batch is big enough to split across the two
    v7x TensorCores.  Tiny batches use a single full-array block."""
    if batch <= 8:
        return batch, 1
    n_tiles = max(_cdiv(batch, DEFAULT_TB), 2)
    tb = _round_up(_cdiv(batch, n_tiles), 8)
    return tb, _cdiv(batch, tb)


def _mlp_kernel(x_ref, w1_ref, b1_ref, w2_ref, b2_ref, w3_ref, b3_ref, o_ref,
                *, act_dtype):
    # Layer 1: in-kernel bf16 cast of the f32 input block, K=459 contraction
    # on the MXU with f32 accumulation.
    x = x_ref[...].astype(jnp.bfloat16)                       # (tb, 459)
    h = jnp.dot(x, w1_ref[...], preferred_element_type=jnp.float32)
    h = _leaky_relu(h.astype(act_dtype) + b1_ref[...].astype(act_dtype))

    # Layer 2.
    h = jnp.dot(h.astype(jnp.bfloat16), w2_ref[...],
                preferred_element_type=jnp.float32)
    h = _leaky_relu(h.astype(act_dtype) + b2_ref[...].astype(act_dtype))

    # Layer 3: (tb, 512) @ (512, 128) lane-dense output block; f32 math.
    o = jnp.dot(h.astype(jnp.bfloat16), w3_ref[...],
                preferred_element_type=jnp.float32) + b3_ref[...]
    o_ref[...] = o.astype(o_ref.dtype)


def prepare_params(params):
    """One-time (load-time) conversion of torch-convention params: transpose
    to (in, out), cast weights to bf16, pad the 6-wide output to 128 lanes."""
    w1t = jnp.transpose(params["w1"]).astype(jnp.bfloat16)    # (459, 512)
    w2t = jnp.transpose(params["w2"]).astype(jnp.bfloat16)    # (512, 512)
    w3t = jnp.transpose(params["w3"]).astype(jnp.bfloat16)    # (512, 6)
    w3p = jnp.zeros((HID, OUT_PAD), jnp.bfloat16).at[:, :OUT_DIM].set(w3t)
    b1 = params["b1"].reshape(1, HID).astype(jnp.float32)
    b2 = params["b2"].reshape(1, HID).astype(jnp.float32)
    b3 = jnp.zeros((1, OUT_PAD), jnp.float32).at[:, :OUT_DIM].set(
        params["b3"].reshape(1, OUT_DIM).astype(jnp.float32))
    return {"w1": w1t, "b1": b1, "w2": w2t, "b2": b2, "w3": w3p, "b3": b3}


def neural_network_v1_forward(x, prepared, act_dtype=None):
    """x: (B, 459) float32.  prepared: output of prepare_params()."""
    batch = x.shape[0]
    if act_dtype is None:
        act_dtype = _default_act_dtype()
    tb, n_tiles = _batch_tiling(batch)

    kernel = functools.partial(_mlp_kernel, act_dtype=act_dtype)
    out = pl.pallas_call(
        kernel,
        out_shape=jax.ShapeDtypeStruct((batch, OUT_PAD), jnp.float32),
        grid=(n_tiles,),
        in_specs=[
            pl.BlockSpec((tb, IN_DIM), lambda i: (i, 0)),      # x: batch-tiled, native f32
            pl.BlockSpec((IN_DIM, HID), lambda i: (0, 0)),     # w1: resident
            pl.BlockSpec((1, HID), lambda i: (0, 0)),          # b1
            pl.BlockSpec((HID, HID), lambda i: (0, 0)),        # w2
            pl.BlockSpec((1, HID), lambda i: (0, 0)),          # b2
            pl.BlockSpec((HID, OUT_PAD), lambda i: (0, 0)),    # w3
            pl.BlockSpec((1, OUT_PAD), lambda i: (0, 0)),      # b3
        ],
        out_specs=pl.BlockSpec((tb, OUT_PAD), lambda i: (i, 0)),
        compiler_params=pltpu.CompilerParams(
            dimension_semantics=("parallel",),   # v7x: shard batch over 2 TCs
            vmem_limit_bytes=32 << 20,           # fits v7x's 64 MiB physical VMEM
        ),
    )(x, prepared["w1"], prepared["b1"], prepared["w2"], prepared["b2"],
      prepared["w3"], prepared["b3"])

    return out[:, :OUT_DIM]


def init_params(key):
    """Deterministic init matching the nn.Linear shapes (torch convention)."""
    ks = jax.random.split(key, 6)

    def unif(k, shape, fan_in):
        bound = 1.0 / jnp.sqrt(fan_in)
        return jax.random.uniform(k, shape, jnp.float32, -bound, bound)

    return {
        "w1": unif(ks[0], (HID, IN_DIM), IN_DIM),
        "b1": unif(ks[1], (HID,), IN_DIM),
        "w2": unif(ks[2], (HID, HID), HID),
        "b2": unif(ks[3], (HID,), HID),
        "w3": unif(ks[4], (OUT_DIM, HID), HID),
        "b3": unif(ks[5], (OUT_DIM,), HID),
    }


if __name__ == "__main__":
    key = jax.random.PRNGKey(0)
    k_param, k_x = jax.random.split(key)
    params = init_params(k_param)

    # One-time parameter preparation (transposes / bf16 / output pad) done at
    # load time, NOT in the per-call forward path.
    prepared = jax.tree_util.tree_map(jax.block_until_ready,
                                      prepare_params(params))

    batch = 2
    x = jax.random.normal(k_x, (batch, IN_DIM), dtype=jnp.float32)

    out = neural_network_v1_forward(x, prepared)
    out = jax.block_until_ready(out)

    # Pure-f32 JAX reference of the same math (torch-convention weights).
    def ref(x, p):
        h = x @ p["w1"].T + p["b1"]
        h = jnp.where(h > 0, h, NEG_SLOPE * h)
        h = h @ p["w2"].T + p["b2"]
        h = jnp.where(h > 0, h, NEG_SLOPE * h)
        return h @ p["w3"].T + p["b3"]

    expected = ref(x, params)
    assert out.shape == (batch, OUT_DIM)
    # bf16 matmul inputs (f32 accumulation) => relaxed tolerance vs. f32 ref.
    assert jnp.allclose(out, expected, atol=5e-2, rtol=5e-2), (
        f"max abs diff {jnp.max(jnp.abs(out - expected))}")

    print("KERNEL_OK")
</pallas_src>

<mosaic_0001>
module attributes {stable_mosaic.version = 11 : i64} {
  func.func @_mlp_kernel(%arg0: i32, %arg1: memref<2x459xf32, #tpu.memory_space<vmem>>, %arg2: memref<459x512xbf16, #tpu.memory_space<vmem>>, %arg3: memref<1x512xf32, #tpu.memory_space<vmem>>, %arg4: memref<512x512xbf16, #tpu.memory_space<vmem>>, %arg5: memref<1x512xf32, #tpu.memory_space<vmem>>, %arg6: memref<512x128xbf16, #tpu.memory_space<vmem>>, %arg7: memref<1x128xf32, #tpu.memory_space<vmem>>, %arg8: memref<2x128xf32, #tpu.memory_space<vmem>>) attributes {dimension_semantics = [#tpu.dimension_semantics<parallel>], iteration_bounds = array<i64: 1>, scalar_prefetch = 0 : i64, scratch_operands = 0 : i64, tpu.core_type = #tpu.core_type<tc>, window_params = [{transform_indices = @transform_0, window_bounds = array<i64: 2, 459>}, {pipeline_mode = #tpu.pipeline_mode<synchronous>, transform_indices = @transform_1, window_bounds = array<i64: 459, 512>}, {pipeline_mode = #tpu.pipeline_mode<synchronous>, transform_indices = @transform_2, window_bounds = array<i64: 1, 512>}, {pipeline_mode = #tpu.pipeline_mode<synchronous>, transform_indices = @transform_3, window_bounds = array<i64: 512, 512>}, {pipeline_mode = #tpu.pipeline_mode<synchronous>, transform_indices = @transform_4, window_bounds = array<i64: 1, 512>}, {pipeline_mode = #tpu.pipeline_mode<synchronous>, transform_indices = @transform_5, window_bounds = array<i64: 512, 128>}, {pipeline_mode = #tpu.pipeline_mode<synchronous>, transform_indices = @transform_6, window_bounds = array<i64: 1, 128>}, {transform_indices = @transform_7, window_bounds = array<i64: 2, 128>}]} {
    %c0 = arith.constant 0 : index
    %c0_0 = arith.constant 0 : index
    %0 = vector.load %arg1[%c0, %c0_0] : memref<2x459xf32, #tpu.memory_space<vmem>>, vector<2x459xf32>
    %1 = arith.truncf %0 : vector<2x459xf32> to vector<2x459xbf16>
    %c0_1 = arith.constant 0 : index
    %c0_2 = arith.constant 0 : index
    %2 = vector.load %arg2[%c0_1, %c0_2] : memref<459x512xbf16, #tpu.memory_space<vmem>>, vector<459x512xbf16>
    %cst = arith.constant dense<0.000000e+00> : vector<2x512xf32>
    %3 = tpu.matmul %1, %2, %cst {dimension_numbers = #tpu.dot_dimension_numbers<[1], [0], [0], [1], [0, 0, 1, 1], [], []>} : vector<2x459xbf16>, vector<459x512xbf16>, vector<2x512xf32> -> vector<2x512xf32>
    %c0_3 = arith.constant 0 : index
    %c0_4 = arith.constant 0 : index
    %4 = vector.load %arg3[%c0_3, %c0_4] : memref<1x512xf32, #tpu.memory_space<vmem>>, vector<1x512xf32>
    %5 = vector.broadcast %4 : vector<1x512xf32> to vector<2x512xf32>
    %6 = arith.addf %3, %5 : vector<2x512xf32>
    %cst_5 = arith.constant 0.00999999977 : f32
    %7 = vector.broadcast %cst_5 : f32 to vector<2x512xf32>
    %8 = arith.mulf %7, %6 : vector<2x512xf32>
    %9 = arith.maximumf %6, %8 : vector<2x512xf32>
    %10 = arith.truncf %9 : vector<2x512xf32> to vector<2x512xbf16>
    %c0_6 = arith.constant 0 : index
    %c0_7 = arith.constant 0 : index
    %11 = vector.load %arg4[%c0_6, %c0_7] : memref<512x512xbf16, #tpu.memory_space<vmem>>, vector<512x512xbf16>
    %cst_8 = arith.constant dense<0.000000e+00> : vector<2x512xf32>
    %12 = tpu.matmul %10, %11, %cst_8 {dimension_numbers = #tpu.dot_dimension_numbers<[1], [0], [0], [1], [0, 0, 1, 1], [], []>} : vector<2x512xbf16>, vector<512x512xbf16>, vector<2x512xf32> -> vector<2x512xf32>
    %c0_9 = arith.constant 0 : index
    %c0_10 = arith.constant 0 : index
    %13 = vector.load %arg5[%c0_9, %c0_10] : memref<1x512xf32, #tpu.memory_space<vmem>>, vector<1x512xf32>
    %14 = vector.broadcast %13 : vector<1x512xf32> to vector<2x512xf32>
    %15 = arith.addf %12, %14 : vector<2x512xf32>
    %cst_11 = arith.constant 0.00999999977 : f32
    %16 = vector.broadcast %cst_11 : f32 to vector<2x512xf32>
    %17 = arith.mulf %16, %15 : vector<2x512xf32>
    %18 = arith.maximumf %15, %17 : vector<2x512xf32>
    %19 = arith.truncf %18 : vector<2x512xf32> to vector<2x512xbf16>
    %c0_12 = arith.constant 0 : index
    %c0_13 = arith.constant 0 : index
    %20 = vector.load %arg6[%c0_12, %c0_13] : memref<512x128xbf16, #tpu.memory_space<vmem>>, vector<512x128xbf16>
    %cst_14 = arith.constant dense<0.000000e+00> : vector<2x128xf32>
    %21 = tpu.matmul %19, %20, %cst_14 {dimension_numbers = #tpu.dot_dimension_numbers<[1], [0], [0], [1], [0, 0, 1, 1], [], []>} : vector<2x512xbf16>, vector<512x128xbf16>, vector<2x128xf32> -> vector<2x128xf32>
    %c0_15 = arith.constant 0 : index
    %c0_16 = arith.constant 0 : index
    %22 = vector.load %arg7[%c0_15, %c0_16] : memref<1x128xf32, #tpu.memory_space<vmem>>, vector<1x128xf32>
    %23 = vector.broadcast %22 : vector<1x128xf32> to vector<2x128xf32>
    %24 = arith.addf %21, %23 : vector<2x128xf32>
    %c0_17 = arith.constant 0 : index
    %c0_18 = arith.constant 0 : index
    %25 = vector.load %arg8[%c0_17, %c0_18] : memref<2x128xf32, #tpu.memory_space<vmem>>, vector<2x128xf32>
    tpu.vector_store %arg8[%c0_17, %c0_18], %24 {strides = array<i32>} : memref<2x128xf32, #tpu.memory_space<vmem>>, vector<2x128xf32>,
    return
  }
  func.func @transform_0(%arg0: i32) -> (i32, i32) {
    %c0_i32 = arith.constant 0 : i32
    %c0_i32_0 = arith.constant 0 : i32
    return %arg0, %c0_i32 : i32, i32
  }
  func.func @transform_1(%arg0: i32) -> (i32, i32) {
    %c0_i32 = arith.constant 0 : i32
    %c0_i32_0 = arith.constant 0 : i32
    %c0_i32_1 = arith.constant 0 : i32
    return %c0_i32, %c0_i32_0 : i32, i32
  }
  func.func @transform_2(%arg0: i32) -> (i32, i32) {
    %c0_i32 = arith.constant 0 : i32
    %c0_i32_0 = arith.constant 0 : i32
    %c0_i32_1 = arith.constant 0 : i32
    return %c0_i32, %c0_i32_0 : i32, i32
  }
  func.func @transform_3(%arg0: i32) -> (i32, i32) {
    %c0_i32 = arith.constant 0 : i32
    %c0_i32_0 = arith.constant 0 : i32
    %c0_i32_1 = arith.constant 0 : i32
    return %c0_i32, %c0_i32_0 : i32, i32
  }
  func.func @transform_4(%arg0: i32) -> (i32, i32) {
    %c0_i32 = arith.constant 0 : i32
    %c0_i32_0 = arith.constant 0 : i32
    %c0_i32_1 = arith.constant 0 : i32
    return %c0_i32, %c0_i32_0 : i32, i32
  }
  func.func @transform_5(%arg0: i32) -> (i32, i32) {
    %c0_i32 = arith.constant 0 : i32
    %c0_i32_0 = arith.constant 0 : i32
    %c0_i32_1 = arith.constant 0 : i32
    return %c0_i32, %c0_i32_0 : i32, i32
  }
  func.func @transform_6(%arg0: i32) -> (i32, i32) {
    %c0_i32 = arith.constant 0 : i32
    %c0_i32_0 = arith.constant 0 : i32
    %c0_i32_1 = arith.constant 0 : i32
    return %c0_i32, %c0_i32_0 : i32, i32
  }
  func.func @transform_7(%arg0: i32) -> (i32, i32) {
    %c0_i32 = arith.constant 0 : i32
    %c0_i32_0 = arith.constant 0 : i32
    return %arg0, %c0_i32 : i32, i32
  }
}

</mosaic_0001>

<bundles_post_ra>
// kernel: tpu_custom_call.1
= control target key start
LH: loop header
LB: loop body
LE: loop exit
PB: predicated region body
PF: predicated region fallthrough
CT: control target
= control target key end

     0   :  { %12 = vsyncpa [#allocation3], 0  ;;  %s3357_s0 = inlined_call_operand.hbm [shape: f32[2,459], index: 0, kind: input, shape index: {}]   ;;  %s3358_s1 = inlined_call_operand.hbm [shape: bf16[459,512], index: 1, kind: input, shape index: {}]   ;;  %s3359_s2 = inlined_call_operand.hbm [shape: f32[1,512], index: 2, kind: input, shape index: {}]   ;;  %s3360_s3 = inlined_call_operand.hbm [shape: bf16[512,512], index: 3, kind: input, shape index: {}]   ;;  %s3361_s4 = inlined_call_operand.vmem [shape: f32[1,512], index: 4, kind: input, shape index: {}]   ;;  %s3362_s5 = inlined_call_operand.hbm [shape: bf16[512,128], index: 5, kind: input, shape index: {}]   ;;  %s3363_s6 = inlined_call_operand.vmem [shape: f32[1,128], index: 6, kind: input, shape index: {}]   ;;  %s3364_s7 = inlined_call_operand.hbm [shape: f32[2,128], index: 7, kind: output, shape index: {}]  }
   0x1   :  { %13 = vsyncpa [#allocation6], 0 }
   0x2   :  { %14 = vsyncpa [#allocation9], 0 }
   0x3   :  { %15 = vsyncpa [#allocation4], 0  ;;  %s3218_s24 = smov [#allocation5]  }
   0x4   :  { %s31_s25 = sshll.u32 %s3218_s24, 4  ;;  %s32_s25 = int_to_ptr.vmem [resolvable:$true] %s31_s25 }
   0x5   :  { %s3098_s26 = scalar_lea.vmem %s32_s25, 14848  ;;  %p3103_p1 = scmp.lt.s32.totalorder %s32_s25, %s32_s25 }
   0x6   :  { %p3099_p0 = scmp.ne.s32.totalorder %s32_s25, %s3098_s26  ;;  %p3104_p2 = scmp.lt.s32.totalorder %s3098_s26, %s3098_s26 }
   0x8   :  { %p3105_p3 = por %p3104_p2, %p3103_p1 }
   0xa   :  { %p3106_p4 = pnand %p3105_p3, %p3099_p0 }
   0xc   :  { %3109 = shalt.err (!%p3106_p4)
}
   0xd   :  { %s3219_s27 = smov 256   ;;  %s3220_s28 = smov 16  }
   0xe   :  { %37 = dma.hbm_to_vmem [thread:$0]  %s3358_s1, 14848, %s32_s25, [#allocation6], %s3219_s27, %s3219_s27, %s3220_s28  }
   0xf   :  { %s3221_s8 = smov [#allocation8]   ;;  %s3222_s10 = smov [#allocation2]  }
  0x10   :  { %s53_s9 = sshll.u32 %s3221_s8, 4  ;;  %s22_s11 = sshll.u32 %s3222_s10, 4  ;;  %s54_s9 = int_to_ptr.vmem [resolvable:$true] %s53_s9  ;;  %s23_s11 = int_to_ptr.vmem [resolvable:$true] %s22_s11 }
  0x11   :  { %s3118_s12 = scalar_lea.vmem %s54_s9, 16384  ;;  %p3123_p6 = scmp.lt.s32.totalorder %s54_s9, %s54_s9 }
  0x12   :  { %p3119_p5 = scmp.ne.s32.totalorder %s54_s9, %s3118_s12  ;;  %p3124_p7 = scmp.lt.s32.totalorder %s3118_s12, %s3118_s12 }
  0x14   :  { %p3125_p8 = por %p3124_p7, %p3123_p6 }
  0x16   :  { %p3126_p9 = pnand %p3125_p8, %p3119_p5 }
  0x18   :  { %3129 = shalt.err (!%p3126_p9)
}
  0x19   :  { %59 = dma.hbm_to_vmem [thread:$0]  %s3360_s3, 16384, %s54_s9, [#allocation9], %s3219_s27, %s3219_s27, %s3220_s28  }
  0x1a   :  { %s3138_s15 = scalar_lea.vmem %s23_s11, 128  ;;  %p3143_p11 = scmp.lt.s32.totalorder %s23_s11, %s23_s11 }
  0x1b   :  { %p3139_p10 = scmp.ne.s32.totalorder %s23_s11, %s3138_s15  ;;  %p3144_p12 = scmp.lt.s32.totalorder %s3138_s15, %s3138_s15 }
  0x1d   :  { %p3145_p13 = por %p3144_p12, %p3143_p11 }
  0x1f   :  { %p3146_p0 = pnand %p3145_p13, %p3139_p10 }
  0x21   :  { %3149 = shalt.err (!%p3146_p0)
}
  0x22   :  { %25 = dma.hbm_to_vmem [thread:$0]  %s3357_s0, 128, %s23_s11, [#allocation3]  }
  0x23   :  { %s3223_s17 = smov [#allocation7]   ;;  %s3224_s19 = smov [#allocation10]  }
  0x24   :  { %s44_s18 = sshll.u32 %s3223_s17, 4  ;;  %s67_s20 = sshll.u32 %s3224_s19, 4  ;;  %s45_s18 = int_to_ptr.vmem [resolvable:$true] %s44_s18  ;;  %s68_s20 = int_to_ptr.vmem [resolvable:$true] %s67_s20 }
  0x25   :  { %s3158_s21 = scalar_lea.vmem %s45_s18, 64  ;;  %p3163_p2 = scmp.lt.s32.totalorder %s45_s18, %s45_s18 }
  0x26   :  { %p3159_p1 = scmp.ne.s32.totalorder %s45_s18, %s3158_s21  ;;  %p3164_p3 = scmp.lt.s32.totalorder %s3158_s21, %s3158_s21 }
  0x28   :  { %p3165_p4 = por %p3164_p3, %p3163_p2 }
  0x2a   :  { %p3166_p5 = pnand %p3165_p4, %p3159_p1 }
  0x2c   :  { %3169 = shalt.err (!%p3166_p5)
}
  0x2d   :  { %47 = dma.hbm_to_vmem [thread:$0]  %s3359_s2, 64, %s45_s18, [#allocation6]  }
  0x2e   :  { %s3178_s23 = scalar_lea.vmem %s68_s20, 4096  ;;  %p3183_p7 = scmp.lt.s32.totalorder %s68_s20, %s68_s20 }
  0x2f   :  { %p3179_p6 = scmp.ne.s32.totalorder %s68_s20, %s3178_s23  ;;  %p3184_p8 = scmp.lt.s32.totalorder %s3178_s23, %s3178_s23 }
  0x31   :  { %p3185_p9 = por %p3184_p8, %p3183_p7 }
  0x33   :  { %p3186_p10 = pnand %p3185_p9, %p3179_p6 }
  0x35   :  { %3189 = shalt.err (!%p3186_p10)
}
  0x36   :  { %s3225_s0 = smov 64   ;;  %s3226_s24 = smov 4  }
  0x37   :  { %73 = dma.hbm_to_vmem [thread:$0]  %s3362_s5, 4096, %s68_s20, [#allocation9], %s3225_s0, %s3225_s0, %s3226_s24  }
  0x38   :  { %3210 = dma.done.wait [#allocation3], 128  }
  0x39   :  { %3211 = vsyncadd [#allocation3], 4294967168 }
  0x3a   :  { %3212 = dma.done.wait [#allocation6], 14912  }
  0x3b   :  { %3213 = vsyncadd [#allocation6], 4294952384 }
  0x3c   :  { %3214 = dma.done.wait [#allocation9], 20480  }
  0x3d   :  { %3215 = vsyncadd [#allocation9], 4294946816  ;;  %v2691_v0 = vld [vmem:[#allocation5 + $0xe4] ss:$16 sps:$4 sm:$0xff]   ;;  %v2695_v2 = vld [vmem:[#allocation5 + $0xe0] ss:$16 sps:$4 sm:$0xff]   ;;  %v98_v35 = vlaneseq }
  0x3e   :  { %v2693_v1 = vld [vmem:[#allocation5 + $0x2e4] ss:$16 sps:$4 sm:$0xff]   ;;  %853 = vmatprep.subr.bf16.mxu0 %v2691_v0  ;;  %v2696_v3 = vld [vmem:[#allocation5 + $0x2e0] ss:$16 sps:$4 sm:$0xff]   ;;  %vm837_vm0 = vcmask 1044480   ;;  %vm838_vm1 = vcmask 1045504  }
  0x3f   :  { %894 = vmatprep.subr.bf16.mxu1 %v2693_v1  ;;  %v2697_v4 = vld [vmem:[#allocation5 + $0xc4] ss:$16 sps:$4 sm:$0xff]   ;;  %854 = vmatpush1.bf16.msra.mxu0 %v2695_v2  ;;  %v2701_v6 = vld [vmem:[#allocation5 + $0xc0] ss:$16 sps:$4 sm:$0xff]   ;;  %v3227_v28 = vmov 65535   ;;  %v3288_v43 = vshrl.u32 %v98_v35, 7 }
  0x40   :  { %895 = vmatpush1.bf16.msra.mxu1 %v2696_v3  ;;  %v2699_v5 = vld [vmem:[#allocation5 + $0x2c4] ss:$16 sps:$4 sm:$0xff]   ;;  %855 = vmatprep.subr.bf16.mxu0 %v2697_v4  ;;  %v2702_v7 = vld [vmem:[#allocation5 + $0x2c0] ss:$16 sps:$4 sm:$0xff]   ;;  %v839_v29 = vsel %vm837_vm0, 4294967295, %v3227_v28  ;;  %v92_v49 = vld [vmem:[#allocation2] sm:$0xff] }
  0x41   :  { %896 = vmatprep.subr.bf16.mxu1 %v2699_v5  ;;  %v2703_v8 = vld [vmem:[#allocation5 + $0xa4] ss:$16 sps:$4 sm:$0xff]   ;;  %v2707_v10 = vld [vmem:[#allocation5 + $0xa0] ss:$16 sps:$4 sm:$0xff]   ;;  %v3228_v33 = vmov 1983009808   ;;  %v94_v51 = vcombine.high %v92_v49, %v92_v49 }
  0x42   :  { %v2705_v9 = vld [vmem:[#allocation5 + $0x2a4] ss:$16 sps:$4 sm:$0xff]   ;;  %v2708_v11 = vld [vmem:[#allocation5 + $0x2a0] ss:$16 sps:$4 sm:$0xff]   ;;  %v96_v34 = vunpack.c.l.s4 %v3228_v33  ;;  %v3285_v36 = vsel %vm838_vm1, %v839_v29, 0  ;;  %vm833_vm2 = vcmask 613376  }
  0x43   :  { %856 = vmatpush1.bf16.msra.mxu0 %v2701_v6  ;;  %v2709_v12 = vld [vmem:[#allocation5 + $0x84] ss:$16 sps:$4 sm:$0xff]   ;;  %v2713_v14 = vld [vmem:[#allocation5 + $0x80] ss:$16 sps:$4 sm:$0xff]   ;;  %v2797_v28 = vld [vmem:[#allocation5 + $0x2c8] ss:$16 sps:$4 sm:$0xff]  }
  0x44   :  { %897 = vmatpush1.bf16.msra.mxu1 %v2702_v7  ;;  %857 = vmatprep.subr.bf16.mxu0 %v2703_v8  ;;  %v2711_v13 = vld [vmem:[#allocation5 + $0x284] ss:$16 sps:$4 sm:$0xff]   ;;  %v2714_v15 = vld [vmem:[#allocation5 + $0x280] ss:$16 sps:$4 sm:$0xff]   ;;  %v97_v42 = vunpack.c.0.s8 %v96_v34  ;;  %v2774_v8 = vld [vmem:[#allocation5 + $0xec] ss:$16 sps:$4 sm:$0xff]  }
  0x45   :  { %898 = vmatprep.subr.bf16.mxu1 %v2705_v9  ;;  %v2715_v16 = vld [vmem:[#allocation5 + $0x64] ss:$16 sps:$4 sm:$0xff]   ;;  %v2719_v18 = vld [vmem:[#allocation5 + $0x60] ss:$16 sps:$4 sm:$0xff]   ;;  %v2802_v29 = vld [vmem:[#allocation5 + $0x4c] ss:$16 sps:$4 sm:$0xff]  }
  0x46   :  { %v2717_v17 = vld [vmem:[#allocation5 + $0x264] ss:$16 sps:$4 sm:$0xff]   ;;  %v2720_v19 = vld [vmem:[#allocation5 + $0x260] ss:$16 sps:$4 sm:$0xff]   ;;  %v100_v48 = vsub.s32 %v97_v42, %v3288_v43  ;;  %v2808_v33 = vld [vmem:[#allocation5 + $0x2c] ss:$16 sps:$4 sm:$0xff]  }
  0x47   :  { %858 = vmatpush1.bf16.msra.mxu0 %v2707_v10  ;;  %v2721_v20 = vld [vmem:[#allocation5 + $0x44] ss:$16 sps:$4 sm:$0xff]   ;;  %v2725_v22 = vld [vmem:[#allocation5 + $0x40] ss:$16 sps:$4 sm:$0xff]   ;;  %v2772_v10 = vld [vmem:[#allocation5 + $0xe8] ss:$16 sps:$4 sm:$0xff]  }
  0x48   :  { %899 = vmatpush1.bf16.msra.mxu1 %v2708_v11  ;;  %859 = vmatprep.subr.bf16.mxu0 %v2709_v12  ;;  %v2723_v21 = vld [vmem:[#allocation5 + $0x244] ss:$16 sps:$4 sm:$0xff]   ;;  %v2726_v23 = vld [vmem:[#allocation5 + $0x240] ss:$16 sps:$4 sm:$0xff]   ;;  %v3292_v52 = vrot.slane %v92_v49, %v100_v48  ;;  %v108_v56 = vrot.slane %v94_v51, %v100_v48  ;;  %v2811_v34 = vld [vmem:[#allocation5 + $0x28c] ss:$16 sps:$4 sm:$0xff]  }
  0x49   :  { %900 = vmatprep.subr.bf16.mxu1 %v2711_v13  ;;  %v2727_v24 = vld [vmem:[#allocation5 + $0x24] ss:$16 sps:$4 sm:$0xff]   ;;  %v2731_v26 = vld [vmem:[#allocation5 + $0x20] ss:$16 sps:$4 sm:$0xff]   ;;  %v2780_v13 = vld [vmem:[#allocation5 + $0xcc] ss:$16 sps:$4 sm:$0xff]  }
  0x4a   :  { %v2729_v25 = vld [vmem:[#allocation5 + $0x224] ss:$16 sps:$4 sm:$0xff]   ;;  %v2732_v27 = vld [vmem:[#allocation5 + $0x220] ss:$16 sps:$4 sm:$0xff]   ;;  %v109_v57 = vcombine.high %v3292_v52, %v3292_v52  ;;  %v110_v60 = vcombine.high %v108_v56, %v108_v56  ;;  %v3300_v9 = vpack.c.bf16 %v108_v56, %v108_v56  ;;  %v2806_v35 = vld [vmem:[#allocation5 + $0x28] ss:$16 sps:$4 sm:$0xff]  }
  0x4b   :  { %860 = vmatpush1.bf16.msra.mxu0 %v2713_v14  ;;  %v2733_v30 = vld [vmem:[#allocation5 + $0x4] ss:$16 sps:$4 sm:$0xff]   ;;  %v2737_v37 = vld [vmem:[#allocation5] ss:$16 sps:$4 sm:$0xff]   ;;  %v2778_v14 = vld [vmem:[#allocation5 + $0xc8] ss:$16 sps:$4 sm:$0xff]  }
  0x4c   :  { %901 = vmatpush1.bf16.msra.mxu1 %v2714_v15  ;;  %861 = vmatprep.subr.bf16.mxu0 %v2715_v16  ;;  %v2735_v31 = vld [vmem:[#allocation5 + $0x204] ss:$16 sps:$4 sm:$0xff]   ;;  %v2738_v38 = vld [vmem:[#allocation5 + $0x200] ss:$16 sps:$4 sm:$0xff]   ;;  %v116_v61 = vpack.c.bf16 %v109_v57, %v109_v57  ;;  %v3296_v0 = vpack.c.bf16 %v110_v60, %v110_v60  ;;  %v2820_v42 = vld [vmem:[#allocation5 + $0x1ec] ss:$16 sps:$4 sm:$0xff]  }
  0x4d   :  { %902 = vmatprep.subr.bf16.mxu1 %v2717_v17  ;;  %v2741_v32 = vld [vmem:[#allocation5 + $0x384] ss:$16 sps:$4 sm:$0x3f]   ;;  %v2744_v39 = vld [vmem:[#allocation5 + $0x380] ss:$16 sps:$4 sm:$0x3f]  }
  0x4e   :  { %v2739_v40 = vld [vmem:[#allocation5 + $0x1e4] ss:$16 sps:$4 sm:$0xff]   ;;  %v845_v41 = vand.u32 %v2741_v32, %v3285_v36  ;;  %v2743_v44 = vld [vmem:[#allocation5 + $0x1e0] ss:$16 sps:$4 sm:$0xff]   ;;  %v842_v45 = vand.u32 %v2744_v39, %v3285_v36  ;;  %885 = vmatprep.mubr.bf16.mxu0 %v116_v61  ;;  %2472 = vmatprep.mubr.msk.bf16.mxu1 %vm833_vm2, %v3296_v0  ;;  %v2786_v17 = vld [vmem:[#allocation5 + $0xac] ss:$16 sps:$4 sm:$0xff]  }
  0x4f   :  { %862 = vmatpush1.bf16.msra.mxu0 %v2719_v18  ;;  %v2745_v46 = vld [vmem:[#allocation5 + $0x1c4] ss:$16 sps:$4 sm:$0xff]   ;;  %v2749_v50 = vld [vmem:[#allocation5 + $0x1c0] ss:$16 sps:$4 sm:$0xff]   ;;  %v2784_v18 = vld [vmem:[#allocation5 + $0xa8] ss:$16 sps:$4 sm:$0xff]  }
  0x50   :  { %903 = vmatpush1.bf16.msra.mxu1 %v2720_v19  ;;  %863 = vmatprep.subr.bf16.mxu0 %v2721_v20  ;;  %v2747_v47 = vld [vmem:[#allocation5 + $0x364] ss:$16 sps:$4 sm:$0xff]   ;;  %v2750_v53 = vld [vmem:[#allocation5 + $0x360] ss:$16 sps:$4 sm:$0xff]   ;;  %v2790_v20 = vld [vmem:[#allocation5 + $0x8c] ss:$16 sps:$4 sm:$0xff]  }
  0x51   :  { %904 = vmatprep.subr.bf16.mxu1 %v2723_v21  ;;  %v2751_v54 = vld [vmem:[#allocation5 + $0x1a4] ss:$16 sps:$4 sm:$0xff]   ;;  %v2755_v58 = vld [vmem:[#allocation5 + $0x1a0] ss:$16 sps:$4 sm:$0xff]   ;;  %v2793_v21 = vld [vmem:[#allocation5 + $0x2ec] ss:$16 sps:$4 sm:$0xff]  }
  0x52   :  { %v2753_v55 = vld [vmem:[#allocation5 + $0x344] ss:$16 sps:$4 sm:$0xff]   ;;  %v2756_v59 = vld [vmem:[#allocation5 + $0x340] ss:$16 sps:$4 sm:$0xff]   ;;  %v2803_v32 = vld [vmem:[#allocation5 + $0x2a8] ss:$16 sps:$4 sm:$0xff]  }
  0x53   :  { %864 = vmatpush1.bf16.msra.mxu0 %v2725_v22  ;;  %v2757_v62 = vld [vmem:[#allocation5 + $0x184] ss:$16 sps:$4 sm:$0xff]   ;;  %v2761_v1 = vld [vmem:[#allocation5 + $0x180] ss:$16 sps:$4 sm:$0xff]   ;;  %v3305_v22 = vpack.c.bf16 %v3292_v52, %v3292_v52  ;;  %v2817_v39 = vld [vmem:[#allocation5 + $0x26c] ss:$16 sps:$4 sm:$0xff]  }
  0x54   :  { %905 = vmatpush1.bf16.msra.mxu1 %v2726_v23  ;;  %865 = vmatprep.subr.bf16.mxu0 %v2727_v24  ;;  %v2759_v63 = vld [vmem:[#allocation5 + $0x324] ss:$16 sps:$4 sm:$0xff]   ;;  %v2762_v2 = vld [vmem:[#allocation5 + $0x320] ss:$16 sps:$4 sm:$0xff]   ;;  %v2788_v23 = vld [vmem:[#allocation5 + $0x88] ss:$16 sps:$4 sm:$0xff]  }
  0x55   :  { %906 = vmatprep.subr.bf16.mxu1 %v2729_v25  ;;  %v2763_v3 = vld [vmem:[#allocation5 + $0x164] ss:$16 sps:$4 sm:$0xff]   ;;  %v2767_v5 = vld [vmem:[#allocation5 + $0x160] ss:$16 sps:$4 sm:$0xff]   ;;  %v2791_v24 = vld [vmem:[#allocation5 + $0x2e8] ss:$16 sps:$4 sm:$0xff]  }
  0x56   :  { %v2765_v4 = vld [vmem:[#allocation5 + $0x304] ss:$16 sps:$4 sm:$0xff]   ;;  %v2768_v6 = vld [vmem:[#allocation5 + $0x300] ss:$16 sps:$4 sm:$0xff]   ;;  %v2796_v25 = vld [vmem:[#allocation5 + $0x6c] ss:$16 sps:$4 sm:$0xff]  }
  0x57   :  { %866 = vmatpush1.bf16.msra.mxu0 %v2731_v26  ;;  %v2770_v7 = vld [vmem:[#allocation5 + $0x144] ss:$16 sps:$4 sm:$0xff]   ;;  %v2775_v11 = vld [vmem:[#allocation5 + $0x140] ss:$16 sps:$4 sm:$0xff]   ;;  %v2799_v26 = vld [vmem:[#allocation5 + $0x2cc] ss:$16 sps:$4 sm:$0xff]  }
  0x58   :  { %907 = vmatpush1.bf16.msra.mxu1 %v2732_v27  ;;  %867 = vmatprep.subr.bf16.mxu0 %v2733_v30  ;;  %v2776_v12 = vld [vmem:[#allocation5 + $0x124] ss:$16 sps:$4 sm:$0xff]   ;;  %v2781_v15 = vld [vmem:[#allocation5 + $0x120] ss:$16 sps:$4 sm:$0xff]   ;;  %v2794_v27 = vld [vmem:[#allocation5 + $0x68] ss:$16 sps:$4 sm:$0xff]  }
  0x59   :  { %908 = vmatprep.subr.bf16.mxu1 %v2735_v31  ;;  %v2782_v16 = vld [vmem:[#allocation5 + $0x104] ss:$16 sps:$4 sm:$0xff]   ;;  %v2787_v19 = vld [vmem:[#allocation5 + $0x100] ss:$16 sps:$4 sm:$0xff]   ;;  %v2805_v30 = vld [vmem:[#allocation5 + $0x2ac] ss:$16 sps:$4 sm:$0xff]  }
  0x5a   :  { %v2800_v31 = vld [vmem:[#allocation5 + $0x48] ss:$16 sps:$4 sm:$0xff]   ;;  %v2829_v48 = vld [vmem:[#allocation5 + $0x22c] ss:$16 sps:$4 sm:$0xff]   ;;  %s3229_s28 = smov [#allocation11]  }
  0x5b   :  { %868 = vmatpush1.bf16.msra.mxu0 %v2737_v37  ;;  %v2809_v37 = vld [vmem:[#allocation5 + $0x288] ss:$16 sps:$4 sm:$0xff]   ;;  %v2832_v51 = vld [vmem:[#allocation5 + $0x1ac] ss:$16 sps:$4 sm:$0xff]   ;;  %s2345_s29 = sshll.u32 %s3229_s28, 4  ;;  %s2346_s29 = int_to_ptr.vmem [resolvable:$true] %s2345_s29 }
  0x5c   :  { %909 = vmatpush1.bf16.msra.mxu1 %v2738_v38  ;;  %869 = vmatprep.subr.bf16.mxu0 %v2739_v40  ;;  %v2814_v38 = vld [vmem:[#allocation5 + $0xc] ss:$16 sps:$4 sm:$0xff]   ;;  %v2812_v40 = vld [vmem:[#allocation5 + $0x8] ss:$16 sps:$4 sm:$0xff]   ;;  %s3190_s30 = scalar_lea.vmem %s2346_s29, 32  ;;  %p3195_p12 = scmp.lt.s32.totalorder %s2346_s29, %s2346_s29 }
  0x5d   :  { %916 = vmatprep.subr.bf16.mxu1 %v845_v41  ;;  %v2815_v41 = vld [vmem:[#allocation5 + $0x268] ss:$16 sps:$4 sm:$0xff]   ;;  %v2835_v52 = vld [vmem:[#allocation5 + $0x20c] ss:$16 sps:$4 sm:$0xff]   ;;  %p3191_p11 = scmp.ne.s32.totalorder %s2346_s29, %s3190_s30  ;;  %p3196_p13 = scmp.lt.s32.totalorder %s3190_s30, %s3190_s30 }
  0x5e   :  { %v2824_v49 = vld [vmem:[#allocation5 + $0x1c8] ss:$16 sps:$4 sm:$0xff]   ;;  %v2838_v57 = vld [vmem:[#allocation5 + $0x18c] ss:$16 sps:$4 sm:$0xff]  }
  0x5f   :  { %870 = vmatpush2.bf16.msra.mxu0 %v2743_v44  ;;  %v2823_v44 = vld [vmem:[#allocation5 + $0x24c] ss:$16 sps:$4 sm:$0xff]   ;;  %v2839_v56 = vld [vmem:[#allocation5 + $0x388] ss:$16 sps:$4 sm:$0x3f]   ;;  %p3197_p0 = por %p3196_p13, %p3195_p12 }
  0x60   :  { %917 = vmatpush2.bf16.msra.mxu1 %v842_v45  ;;  %871 = vmatprep.subr.bf16.mxu0 %v2745_v46  ;;  %v2818_v45 = vld [vmem:[#allocation5 + $0x1e8] ss:$16 sps:$4 sm:$0xff]   ;;  %v2844_v60 = vld [vmem:[#allocation5 + $0x16c] ss:$16 sps:$4 sm:$0xff]  }
  0x61   :  { %918 = vmatprep.subr.bf16.mxu1 %v2747_v47  ;;  %v2821_v46 = vld [vmem:[#allocation5 + $0x248] ss:$16 sps:$4 sm:$0xff]   ;;  %v2826_v47 = vld [vmem:[#allocation5 + $0x1cc] ss:$16 sps:$4 sm:$0xff]   ;;  %p3198_p1 = pnand %p3197_p0, %p3191_p11 }
  0x63   :  { %872 = vmatpush2.bf16.msra.mxu0 %v2749_v50  ;;  %v2827_v50 = vld [vmem:[#allocation5 + $0x228] ss:$16 sps:$4 sm:$0xff]  }
  0x64   :  { %919 = vmatpush2.bf16.msra.mxu1 %v2750_v53  ;;  %873 = vmatprep.subr.bf16.mxu0 %v2751_v54  ;;  %v2841_v53 = vld [vmem:[#allocation5 + $0x38c] ss:$16 sps:$4 sm:$0x3f]   ;;  %v2830_v54 = vld [vmem:[#allocation5 + $0x1a8] ss:$16 sps:$4 sm:$0xff]  }
  0x65   :  { %920 = vmatprep.subr.bf16.mxu1 %v2753_v55  ;;  %v2833_v55 = vld [vmem:[#allocation5 + $0x208] ss:$16 sps:$4 sm:$0xff]  }
  0x67   :  { %874 = vmatpush2.bf16.msra.mxu0 %v2755_v58  ;;  %v851_v58 = vand.u32 %v2841_v53, %v3285_v36  ;;  %v2899_v53 = vld [vmem:[#allocation8 + $0x180] ss:$16 sps:$4 sm:$0xff]  }
  0x68   :  { %921 = vmatpush2.bf16.msra.mxu1 %v2756_v59  ;;  %875 = vmatprep.subr.bf16.mxu0 %v2757_v62  ;;  %v2836_v59 = vld [vmem:[#allocation5 + $0x188] ss:$16 sps:$4 sm:$0xff]   ;;  %v848_v62 = vand.u32 %v2839_v56, %v3285_v36 }
  0x69   :  { %922 = vmatprep.subr.bf16.mxu1 %v2759_v63  ;;  %v2842_v63 = vld [vmem:[#allocation5 + $0x168] ss:$16 sps:$4 sm:$0xff]  }
  0x6a   :  { %v2857_v36 = vld [vmem:[#allocation5 + $0x328] ss:$16 sps:$4 sm:$0xff]  }
  0x6b   :  { %876 = vmatpush2.bf16.msra.mxu0 %v2761_v1  ;;  %v2850_v1 = vld [vmem:[#allocation5 + $0x14c] ss:$16 sps:$4 sm:$0xff]   ;;  %v2955_v56 = vld [vmem:[#allocation8 + $0x3e4] ss:$16 sps:$4 sm:$0xff]  }
  0x6c   :  { %923 = vmatpush2.bf16.msra.mxu1 %v2762_v2  ;;  %877 = vmatprep.subr.bf16.mxu0 %v2763_v3  ;;  %v2853_v2 = vld [vmem:[#allocation5 + $0x34c] ss:$16 sps:$4 sm:$0xff]   ;;  %v2848_v3 = vld [vmem:[#allocation5 + $0x148] ss:$16 sps:$4 sm:$0xff]  }
  0x6d   :  { %924 = vmatprep.subr.bf16.mxu1 %v2765_v4  ;;  %v2851_v4 = vld [vmem:[#allocation5 + $0x348] ss:$16 sps:$4 sm:$0xff]  }
  0x6f   :  { %878 = vmatpush2.bf16.msra.mxu0 %v2767_v5  ;;  %v2856_v5 = vld [vmem:[#allocation5 + $0x12c] ss:$16 sps:$4 sm:$0xff]  }
  0x70   :  { %925 = vmatpush2.bf16.msra.mxu1 %v2768_v6  ;;  %879 = vmatprep.subr.bf16.mxu0 %v2770_v7  ;;  %v2859_v6 = vld [vmem:[#allocation5 + $0x32c] ss:$16 sps:$4 sm:$0xff]   ;;  %v2854_v7 = vld [vmem:[#allocation5 + $0x128] ss:$16 sps:$4 sm:$0xff]  }
  0x71   :  { %935 = vmatprep.subr.bf16.mxu1 %v2774_v8  ;;  %v2862_v8 = vld [vmem:[#allocation5 + $0x10c] ss:$16 sps:$4 sm:$0xff]  }
  0x73   :  { %927 = vmatmul.mubr.bf16.vlgmr.msra.gmra.mxu1 %v3300_v9  ;;  %880 = vmatpush2.bf16.msra.mxu0 %v2775_v11  ;;  %v2860_v11 = vld [vmem:[#allocation5 + $0x108] ss:$16 sps:$4 sm:$0xff]  }
  0x74   :  { %936 = vmatpush1.bf16.msra.mxu1 %v2772_v10  ;;  %881 = vmatprep.subr.bf16.mxu0 %v2776_v12  ;;  %v2865_v10 = vld [vmem:[#allocation5 + $0x30c] ss:$16 sps:$4 sm:$0xff]   ;;  %v2863_v12 = vld [vmem:[#allocation5 + $0x308] ss:$16 sps:$4 sm:$0xff]  }
  0x75   :  { %937 = vmatprep.subr.bf16.mxu1 %v2780_v13  ;;  %967 = vmatprep.mubr.bf16.mxu1 %v116_v61  ;;  %v2847_v61 = vld [vmem:[#allocation5 + $0x36c] ss:$16 sps:$4 sm:$0xff]   ;;  %v2868_v13 = vld [vmem:[#allocation8 + $0xe4] ss:$16 sps:$4 sm:$0xff]  }
  0x77   :  { %882 = vmatpush2.bf16.msra.mxu0 %v2781_v15  ;;  %v2871_v15 = vld [vmem:[#allocation8 + $0xc4] ss:$16 sps:$4 sm:$0xff]  }
  0x78   :  { %938 = vmatpush1.bf16.msra.mxu1 %v2778_v14  ;;  %883 = vmatprep.subr.bf16.mxu0 %v2782_v16  ;;  %v2866_v14 = vld [vmem:[#allocation8 + $0xe0] ss:$16 sps:$4 sm:$0xff]  }
  0x79   :  { %939 = vmatprep.subr.bf16.mxu1 %v2786_v17  ;;  %v2869_v16 = vld [vmem:[#allocation8 + $0xc0] ss:$16 sps:$4 sm:$0xff]   ;;  %v2874_v17 = vld [vmem:[#allocation8 + $0xa4] ss:$16 sps:$4 sm:$0xff]  }
  0x7b   :  { %884 = vmatpush2.bf16.msra.mxu0 %v2787_v19  ;;  %v2877_v19 = vld [vmem:[#allocation8 + $0x84] ss:$16 sps:$4 sm:$0xff]  }
  0x7c   :  { %940 = vmatpush1.bf16.msra.mxu1 %v2784_v18  ;;  %976 = vmatprep.subr.bf16.mxu0 %v2793_v21  ;;  %v2872_v18 = vld [vmem:[#allocation8 + $0xa0] ss:$16 sps:$4 sm:$0xff]   ;;  %v2880_v21 = vld [vmem:[#allocation8 + $0x64] ss:$16 sps:$4 sm:$0xff]  }
  0x7d   :  { %941 = vmatprep.subr.bf16.mxu1 %v2790_v20  ;;  %v2875_v20 = vld [vmem:[#allocation8 + $0x80] ss:$16 sps:$4 sm:$0xff]  }
  0x7e   :  { %886 = vmatmul.mubr.bf16.vlgmr.msra.gmra.mxu0 %v3305_v22 }
  0x7f   :  { %977 = vmatpush1.bf16.msra.mxu0 %v2791_v24  ;;  %2473 = vmatprep.mubr.msk.bf16.mxu0 %vm833_vm2, %v3296_v0  ;;  %v2845_v0 = vld [vmem:[#allocation5 + $0x368] ss:$16 sps:$4 sm:$0xff]  }
  0x80   :  { %942 = vmatpush1.bf16.msra.mxu1 %v2788_v23  ;;  %978 = vmatprep.subr.bf16.mxu0 %v2799_v26  ;;  %v2878_v23 = vld [vmem:[#allocation8 + $0x60] ss:$16 sps:$4 sm:$0xff]   ;;  %v2910_v24 = vld [vmem:[#allocation8 + $0x2e4] ss:$16 sps:$4 sm:$0xff]  }
  0x81   :  { %943 = vmatprep.subr.bf16.mxu1 %v2796_v25  ;;  %v2883_v25 = vld [vmem:[#allocation8 + $0x44] ss:$16 sps:$4 sm:$0xff]   ;;  %v2908_v26 = vld [vmem:[#allocation8 + $0x2e0] ss:$16 sps:$4 sm:$0xff]  }
  0x83   :  { %979 = vmatpush1.bf16.msra.mxu0 %v2797_v28  ;;  %v2914_v28 = vld [vmem:[#allocation8 + $0x2c0] ss:$16 sps:$4 sm:$0xff]  }
  0x84   :  { %944 = vmatpush1.bf16.msra.mxu1 %v2794_v27  ;;  %980 = vmatprep.subr.bf16.mxu0 %v2805_v30  ;;  %v2886_v27 = vld [vmem:[#allocation8 + $0x24] ss:$16 sps:$4 sm:$0xff]  }
  0x85   :  { %945 = vmatprep.subr.bf16.mxu1 %v2802_v29  ;;  %v2884_v29 = vld [vmem:[#allocation8 + $0x20] ss:$16 sps:$4 sm:$0xff]   ;;  %v2922_v30 = vld [vmem:[#allocation8 + $0x2a4] ss:$16 sps:$4 sm:$0xff]  }
  0x87   :  { %981 = vmatpush1.bf16.msra.mxu0 %v2803_v32  ;;  %v2920_v32 = vld [vmem:[#allocation8 + $0x2a0] ss:$16 sps:$4 sm:$0xff]  }
  0x88   :  { %946 = vmatpush1.bf16.msra.mxu1 %v2800_v31  ;;  %982 = vmatprep.subr.bf16.mxu0 %v2811_v34  ;;  %v2889_v31 = vld [vmem:[#allocation8 + $0x4] ss:$16 sps:$4 sm:$0xff]  }
  0x89   :  { %947 = vmatprep.subr.bf16.mxu1 %v2808_v33  ;;  %v2887_v33 = vld [vmem:[#allocation8] ss:$16 sps:$4 sm:$0xff]   ;;  %v2925_v34 = vld [vmem:[#allocation8 + $0x284] ss:$16 sps:$4 sm:$0xff]  }
  0x8b   :  { %983 = vmatpush1.bf16.msra.mxu0 %v2809_v37  ;;  %v2923_v37 = vld [vmem:[#allocation8 + $0x280] ss:$16 sps:$4 sm:$0xff]  }
  0x8c   :  { %948 = vmatpush1.bf16.msra.mxu1 %v2806_v35  ;;  %984 = vmatprep.subr.bf16.mxu0 %v2817_v39  ;;  %v2892_v35 = vld [vmem:[#allocation8 + $0x1e4] ss:$16 sps:$4 sm:$0xff]   ;;  %v2929_v39 = vld [vmem:[#allocation8 + $0x260] ss:$16 sps:$4 sm:$0xff]  }
  0x8d   :  { %949 = vmatprep.subr.bf16.mxu1 %v2814_v38  ;;  %v2890_v38 = vld [vmem:[#allocation8 + $0x1e0] ss:$16 sps:$4 sm:$0xff]  }
  0x8f   :  { %985 = vmatpush1.bf16.msra.mxu0 %v2815_v41  ;;  %v2895_v41 = vld [vmem:[#allocation8 + $0x1c4] ss:$16 sps:$4 sm:$0xff]  }
  0x90   :  { %950 = vmatpush1.bf16.msra.mxu1 %v2812_v40  ;;  %986 = vmatprep.subr.bf16.mxu0 %v2823_v44  ;;  %v2931_v40 = vld [vmem:[#allocation8 + $0x264] ss:$16 sps:$4 sm:$0xff]   ;;  %v2935_v44 = vld [vmem:[#allocation8 + $0x240] ss:$16 sps:$4 sm:$0xff]  }
  0x91   :  { %951 = vmatprep.subr.bf16.mxu1 %v2820_v42  ;;  %v2893_v42 = vld [vmem:[#allocation8 + $0x1c0] ss:$16 sps:$4 sm:$0xff]  }
  0x93   :  { %987 = vmatpush1.bf16.msra.mxu0 %v2821_v46  ;;  %v2898_v46 = vld [vmem:[#allocation8 + $0x1a4] ss:$16 sps:$4 sm:$0xff]  }
  0x94   :  { %952 = vmatpush2.bf16.msra.mxu1 %v2818_v45  ;;  %988 = vmatprep.subr.bf16.mxu0 %v2829_v48  ;;  %v2937_v45 = vld [vmem:[#allocation8 + $0x244] ss:$16 sps:$4 sm:$0xff]   ;;  %v2941_v48 = vld [vmem:[#allocation8 + $0x220] ss:$16 sps:$4 sm:$0xff]  }
  0x95   :  { %953 = vmatprep.subr.bf16.mxu1 %v2826_v47  ;;  %v2896_v47 = vld [vmem:[#allocation8 + $0x1a0] ss:$16 sps:$4 sm:$0xff]  }
  0x97   :  { %989 = vmatpush1.bf16.msra.mxu0 %v2827_v50  ;;  %v2901_v50 = vld [vmem:[#allocation8 + $0x184] ss:$16 sps:$4 sm:$0xff]  }
  0x98   :  { %954 = vmatpush2.bf16.msra.mxu1 %v2824_v49  ;;  %990 = vmatprep.subr.bf16.mxu0 %v2835_v52  ;;  %v2943_v49 = vld [vmem:[#allocation8 + $0x224] ss:$16 sps:$4 sm:$0xff]  }
  0x99   :  { %955 = vmatprep.subr.bf16.mxu1 %v2832_v51  ;;  %v2947_v51 = vld [vmem:[#allocation8 + $0x200] ss:$16 sps:$4 sm:$0xff]   ;;  %v2949_v52 = vld [vmem:[#allocation8 + $0x204] ss:$16 sps:$4 sm:$0xff]  }
  0x9b   :  { %991 = vmatpush1.bf16.msra.mxu0 %v2833_v55  ;;  %v2953_v55 = vld [vmem:[#allocation8 + $0x3e0] ss:$16 sps:$4 sm:$0xff]  }
  0x9c   :  { %956 = vmatpush2.bf16.msra.mxu1 %v2830_v54  ;;  %998 = vmatprep.subr.bf16.mxu0 %v851_v58  ;;  %v2904_v54 = vld [vmem:[#allocation8 + $0x164] ss:$16 sps:$4 sm:$0xff]  }
  0x9d   :  { %957 = vmatprep.subr.bf16.mxu1 %v2838_v57  ;;  %v2902_v57 = vld [vmem:[#allocation8 + $0x160] ss:$16 sps:$4 sm:$0xff]   ;;  %v2907_v58 = vld [vmem:[#allocation8 + $0x144] ss:$16 sps:$4 sm:$0xff]  }
  0x9f   :  { %999 = vmatpush2.bf16.msra.mxu0 %v848_v62  ;;  %v2913_v62 = vld [vmem:[#allocation8 + $0x124] ss:$16 sps:$4 sm:$0xff]  }
  0xa0   :  { %958 = vmatpush2.bf16.msra.mxu1 %v2836_v59  ;;  %1000 = vmatprep.subr.bf16.mxu0 %v2847_v61  ;;  %v2959_v59 = vld [vmem:[#allocation8 + $0x3c0] ss:$16 sps:$4 sm:$0xff]  }
  0xa1   :  { %959 = vmatprep.subr.bf16.mxu1 %v2844_v60  ;;  %v2961_v60 = vld [vmem:[#allocation8 + $0x3c4] ss:$16 sps:$4 sm:$0xff]   ;;  %v2905_v61 = vld [vmem:[#allocation8 + $0x140] ss:$16 sps:$4 sm:$0xff]  }
  0xa3   :  { %1001 = vmatpush2.bf16.msra.mxu0 %v2845_v0  ;;  %v2967_v0 = vld [vmem:[#allocation8 + $0x3a4] ss:$16 sps:$4 sm:$0xff]  }
  0xa4   :  { %960 = vmatpush2.bf16.msra.mxu1 %v2842_v63  ;;  %1002 = vmatprep.subr.bf16.mxu0 %v2853_v2  ;;  %v2965_v63 = vld [vmem:[#allocation8 + $0x3a0] ss:$16 sps:$4 sm:$0xff]   ;;  %v2919_v2 = vld [vmem:[#allocation8 + $0x104] ss:$16 sps:$4 sm:$0xff]  }
  0xa5   :  { %961 = vmatprep.subr.bf16.mxu1 %v2850_v1  ;;  %v2911_v1 = vld [vmem:[#allocation8 + $0x120] ss:$16 sps:$4 sm:$0xff]  }
  0xa7   :  { %1003 = vmatpush2.bf16.msra.mxu0 %v2851_v4  ;;  %v2973_v4 = vld [vmem:[#allocation8 + $0x384] ss:$16 sps:$4 sm:$0xff]  }
  0xa8   :  { %962 = vmatpush2.bf16.msra.mxu1 %v2848_v3  ;;  %1004 = vmatprep.subr.bf16.mxu0 %v2859_v6  ;;  %v2971_v3 = vld [vmem:[#allocation8 + $0x380] ss:$16 sps:$4 sm:$0xff]   ;;  %v2928_v6 = vld [vmem:[#allocation8 + $0xec] ss:$16 sps:$4 sm:$0xff]  }
  0xa9   :  { %963 = vmatprep.subr.bf16.mxu1 %v2856_v5  ;;  %v2917_v5 = vld [vmem:[#allocation8 + $0x100] ss:$16 sps:$4 sm:$0xff]  }
  0xab   :  { %1005 = vmatpush2.bf16.msra.mxu0 %v2857_v36  ;;  %v2979_v36 = vld [vmem:[#allocation8 + $0x364] ss:$16 sps:$4 sm:$0xff]  }
  0xac   :  { %964 = vmatpush2.bf16.msra.mxu1 %v2854_v7  ;;  %1006 = vmatprep.subr.bf16.mxu0 %v2865_v10  ;;  %v2977_v7 = vld [vmem:[#allocation8 + $0x360] ss:$16 sps:$4 sm:$0xff]  }
  0xad   :  { %965 = vmatprep.subr.bf16.mxu1 %v2862_v8  ;;  %v2985_v8 = vld [vmem:[#allocation8 + $0x344] ss:$16 sps:$4 sm:$0xff]   ;;  %v2983_v10 = vld [vmem:[#allocation8 + $0x340] ss:$16 sps:$4 sm:$0xff]  }
  0xaf   :  { %1007 = vmatpush2.bf16.msra.mxu0 %v2863_v12  ;;  %v2989_v12 = vld [vmem:[#allocation8 + $0x320] ss:$16 sps:$4 sm:$0xff]  }
  0xb0   :  { %966 = vmatpush2.bf16.msra.mxu1 %v2860_v11  ;;  %1819 = vmatprep.subr.bf16.mxu0 %v2868_v13  ;;  %v2991_v11 = vld [vmem:[#allocation8 + $0x324] ss:$16 sps:$4 sm:$0xff]  }
  0xb1   :  { %1860 = vmatprep.subr.bf16.mxu1 %v2910_v24  ;;  %v2997_v13 = vld [vmem:[#allocation8 + $0x304] ss:$16 sps:$4 sm:$0xff]  }
  0xb2   :  { %1009 = vmatmul.mubr.bf16.vlgmr.msra.gmra.mxu0 %v3300_v9  ;;  %v2881_v9 = vld [vmem:[#allocation8 + $0x40] ss:$16 sps:$4 sm:$0xff]  }
  0xb3   :  { %968 = vmatmul.mubr.bf16.vlgmr.msra.gmra.mxu1 %v3305_v22  ;;  %1820 = vmatpush1.bf16.msra.mxu0 %v2866_v14  ;;  %v2916_v22 = vld [vmem:[#allocation8 + $0x2c4] ss:$16 sps:$4 sm:$0xff]   ;;  %v2995_v14 = vld [vmem:[#allocation8 + $0x300] ss:$16 sps:$4 sm:$0xff]  }
  0xb4   :  { %1821 = vmatprep.subr.bf16.mxu0 %v2871_v15  ;;  %1861 = vmatpush1.bf16.msra.mxu1 %v2908_v26  ;;  %v3006_v15 = vld [vmem:[#allocation8 + $0x2ec] ss:$16 sps:$4 sm:$0xff]  }
  0xb5   :  { %1862 = vmatprep.subr.bf16.mxu1 %v2916_v22 }
  0xb7   :  { %1822 = vmatpush1.bf16.msra.mxu0 %v2869_v16 }
  0xb8   :  { %1823 = vmatprep.subr.bf16.mxu0 %v2874_v17  ;;  %1863 = vmatpush1.bf16.msra.mxu1 %v2914_v28 }
  0xb9   :  { %1864 = vmatprep.subr.bf16.mxu1 %v2922_v30 }
  0xbb   :  { %1824 = vmatpush1.bf16.msra.mxu0 %v2872_v18 }
  0xbc   :  { %1825 = vmatprep.subr.bf16.mxu0 %v2877_v19  ;;  %1865 = vmatpush1.bf16.msra.mxu1 %v2920_v32  ;;  %v239_v19 = vsub.s32 0, %v3288_v43 }
  0xbd   :  { %1866 = vmatprep.subr.bf16.mxu1 %v2925_v34 }
  0xbf   :  { %1826 = vmatpush1.bf16.msra.mxu0 %v2875_v20 }
  0xc0   :  { %1827 = vmatprep.subr.bf16.mxu0 %v2880_v21  ;;  %1867 = vmatpush1.bf16.msra.mxu1 %v2923_v37  ;;  %v3315_v21 = vld [vmem:[#allocation7] sm:$0xf] }
  0xc1   :  { %1868 = vmatprep.subr.bf16.mxu1 %v2931_v40  ;;  %v240_v24 = vrot.slane %v3315_v21, %v239_v19  ;;  %v2934_v40 = vld [vmem:[#allocation8 + $0xcc] ss:$16 sps:$4 sm:$0xff]  }
  0xc3   :  { %1828 = vmatpush1.bf16.msra.mxu0 %v2878_v23  ;;  %v243_v23 = vsub.s32 1, %v3288_v43 }
  0xc4   :  { %1829 = vmatprep.subr.bf16.mxu0 %v2883_v25  ;;  %1869 = vmatpush1.bf16.msra.mxu1 %v2929_v39 }
  0xc5   :  { %1870 = vmatprep.subr.bf16.mxu1 %v2937_v45  ;;  %v244_v25 = vrot.slane %v3315_v21, %v243_v23  ;;  %v2946_v45 = vld [vmem:[#allocation8 + $0x8c] ss:$16 sps:$4 sm:$0xff]  }
  0xc7   :  { %1830 = vmatpush1.bf16.msra.mxu0 %v2881_v9 }
  0xc8   :  { %1831 = vmatprep.subr.bf16.mxu0 %v2886_v27  ;;  %1871 = vmatpush1.bf16.msra.mxu1 %v2935_v44  ;;  %v2938_v44 = vld [vmem:[#allocation8 + $0xa8] ss:$16 sps:$4 sm:$0xff]  }
  0xc9   :  { %1872 = vmatprep.subr.bf16.mxu1 %v2943_v49  ;;  %v2958_v49 = vld [vmem:[#allocation8 + $0x4c] ss:$16 sps:$4 sm:$0xff]  }
  0xcb   :  { %1832 = vmatpush1.bf16.msra.mxu0 %v2884_v29 }
  0xcc   :  { %1833 = vmatprep.subr.bf16.mxu0 %v2889_v31  ;;  %1873 = vmatpush1.bf16.msra.mxu1 %v2941_v48  ;;  %v2950_v48 = vld [vmem:[#allocation8 + $0x68] ss:$16 sps:$4 sm:$0xff]  }
  0xcd   :  { %1874 = vmatprep.subr.bf16.mxu1 %v2949_v52  ;;  %v2962_v52 = vld [vmem:[#allocation8 + $0x28] ss:$16 sps:$4 sm:$0xff]  }
  0xcf   :  { %1834 = vmatpush1.bf16.msra.mxu0 %v2887_v33 }
  0xd0   :  { %1835 = vmatprep.subr.bf16.mxu0 %v2892_v35  ;;  %1875 = vmatpush1.bf16.msra.mxu1 %v2947_v51  ;;  %v2964_v51 = vld [vmem:[#allocation8 + $0x2c] ss:$16 sps:$4 sm:$0xff]  }
  0xd1   :  { %1876 = vmatprep.subr.bf16.mxu1 %v2955_v56  ;;  %v2974_v56 = vld [vmem:[#allocation8 + $0x1e8] ss:$16 sps:$4 sm:$0xff]  }
  0xd3   :  { %1836 = vmatpush2.bf16.msra.mxu0 %v2890_v38  ;;  %v2926_v38 = vld [vmem:[#allocation8 + $0xe8] ss:$16 sps:$4 sm:$0xff]  }
  0xd4   :  { %1837 = vmatprep.subr.bf16.mxu0 %v2895_v41  ;;  %1877 = vmatpush2.bf16.msra.mxu1 %v2953_v55  ;;  %v2932_v41 = vld [vmem:[#allocation8 + $0xc8] ss:$16 sps:$4 sm:$0xff]   ;;  %v2976_v55 = vld [vmem:[#allocation8 + $0x1ec] ss:$16 sps:$4 sm:$0xff]  }
  0xd5   :  { %1878 = vmatprep.subr.bf16.mxu1 %v2961_v60  ;;  %v251_v60 = vsub.s32 3, %v3288_v43 }
  0xd7   :  { %1838 = vmatpush2.bf16.msra.mxu0 %v2893_v42  ;;  %v2940_v42 = vld [vmem:[#allocation8 + $0xac] ss:$16 sps:$4 sm:$0xff]  }
  0xd8   :  { %1839 = vmatprep.subr.bf16.mxu0 %v2898_v46  ;;  %1879 = vmatpush2.bf16.msra.mxu1 %v2959_v59  ;;  %v2944_v46 = vld [vmem:[#allocation8 + $0x88] ss:$16 sps:$4 sm:$0xff]  }
  0xd9   :  { %1880 = vmatprep.subr.bf16.mxu1 %v2967_v0  ;;  %v2980_v59 = vld [vmem:[#allocation8 + $0x1c8] ss:$16 sps:$4 sm:$0xff]   ;;  %v252_v0 = vrot.slane %v3315_v21, %v251_v60 }
  0xdb   :  { %1840 = vmatpush2.bf16.msra.mxu0 %v2896_v47  ;;  %v2952_v47 = vld [vmem:[#allocation8 + $0x6c] ss:$16 sps:$4 sm:$0xff]  }
  0xdc   :  { %1841 = vmatprep.subr.bf16.mxu0 %v2901_v50  ;;  %1881 = vmatpush2.bf16.msra.mxu1 %v2965_v63  ;;  %v2956_v50 = vld [vmem:[#allocation8 + $0x48] ss:$16 sps:$4 sm:$0xff]  }
  0xdd   :  { %1882 = vmatprep.subr.bf16.mxu1 %v2973_v4  ;;  %v2986_v63 = vld [vmem:[#allocation8 + $0x1a8] ss:$16 sps:$4 sm:$0xff]  }
  0xdf   :  { %1842 = vmatpush2.bf16.msra.mxu0 %v2899_v53  ;;  %v2970_v53 = vld [vmem:[#allocation8 + $0xc] ss:$16 sps:$4 sm:$0xff]  }
  0xe0   :  { %1843 = vmatprep.subr.bf16.mxu0 %v2904_v54  ;;  %1883 = vmatpush2.bf16.msra.mxu1 %v2971_v3  ;;  %v2968_v54 = vld [vmem:[#allocation8 + $0x8] ss:$16 sps:$4 sm:$0xff]   ;;  %v2994_v3 = vld [vmem:[#allocation8 + $0x18c] ss:$16 sps:$4 sm:$0xff]  }
  0xe1   :  { %1884 = vmatprep.subr.bf16.mxu1 %v2979_v36 }
  0xe3   :  { %1844 = vmatpush2.bf16.msra.mxu0 %v2902_v57  ;;  %v2982_v57 = vld [vmem:[#allocation8 + $0x1cc] ss:$16 sps:$4 sm:$0xff]  }
  0xe4   :  { %1845 = vmatprep.subr.bf16.mxu0 %v2907_v58  ;;  %1885 = vmatpush2.bf16.msra.mxu1 %v2977_v7  ;;  %v247_v58 = vsub.s32 2, %v3288_v43 }
  0xe5   :  { %1886 = vmatprep.subr.bf16.mxu1 %v2985_v8  ;;  %v2992_v8 = vld [vmem:[#allocation8 + $0x188] ss:$16 sps:$4 sm:$0xff]  }
  0xe7   :  { %1846 = vmatpush2.bf16.msra.mxu0 %v2905_v61  ;;  %v2988_v61 = vld [vmem:[#allocation8 + $0x1ac] ss:$16 sps:$4 sm:$0xff]  }
  0xe8   :  { %1847 = vmatprep.subr.bf16.mxu0 %v2913_v62  ;;  %1887 = vmatpush2.bf16.msra.mxu1 %v2983_v10  ;;  %v248_v62 = vrot.slane %v3315_v21, %v247_v58  ;;  %v3003_v21 = vld [vmem:[#allocation8 + $0x14c] ss:$16 sps:$4 sm:$0xff]  }
  0xe9   :  { %1888 = vmatprep.subr.bf16.mxu1 %v2991_v11 }
  0xeb   :  { %1848 = vmatpush2.bf16.msra.mxu0 %v2911_v1 }
  0xec   :  { %1849 = vmatprep.subr.bf16.mxu0 %v2919_v2  ;;  %1889 = vmatpush2.bf16.msra.mxu1 %v2989_v12  ;;  %v3000_v12 = vld [vmem:[#allocation8 + $0x16c] ss:$16 sps:$4 sm:$0xff]  }
  0xed   :  { %1890 = vmatprep.subr.bf16.mxu1 %v2997_v13 }
  0xef   :  { %1850 = vmatpush2.bf16.msra.mxu0 %v2917_v5 }
  0xf0   :  { %1901 = vmatprep.subr.bf16.mxu0 %v2928_v6  ;;  %1891 = vmatpush2.bf16.msra.mxu1 %v2995_v14 }
  0xf1   :  { %1942 = vmatprep.subr.bf16.mxu1 %v3006_v15 }
 0x133   :  { %v928_v16 = vpop.f32.mrf.mxu1 }
 0x135   :  { %v930_v17 = vpop.f32.mrf.mxu1 }
 0x137   :  { %v932_v18 = vpop.f32.mrf.mxu1 }
 0x138   :  { %v2998_v18 = vld [vmem:[#allocation8 + $0x168] ss:$16 sps:$4 sm:$0xff]  }
 0x139   :  { %v933_v20 = vpop.f32.mrf.mxu1 }
 0x13e   :  { %v887_v26 = vpop.f32.mrf.mxu0 }
 0x13f   :  { %v888_v9 = vadd.f32 %v887_v26, %v240_v24  ;;  %v3001_v26 = vld [vmem:[#allocation8 + $0x148] ss:$16 sps:$4 sm:$0xff]  }
 0x140   :  { %v889_v22 = vpop.f32.mrf.mxu0 }
 0x141   :  { %v929_v27 = vadd.f32 %v928_v16, %v888_v9  ;;  %v890_v28 = vadd.f32 %v889_v22, %v244_v25  ;;  %v3004_v9 = vld [vmem:[#allocation8 + $0x2e8] ss:$16 sps:$4 sm:$0xff]  }
 0x142   :  { %v891_v29 = vpop.f32.mrf.mxu0 }
 0x143   :  { %v1017_v30 = vmul.f32 0.01, %v929_v27  ;;  %v931_v31 = vadd.f32 %v930_v17, %v890_v28  ;;  %v3012_v28 = vld [vmem:[#allocation8 + $0x2cc] ss:$16 sps:$4 sm:$0xff]   ;;  %v3007_v29 = vld [vmem:[#allocation8 + $0x128] ss:$16 sps:$4 sm:$0xff]  }
 0x144   :  { %v892_v32 = vpop.f32.mrf.mxu0 }
 0x145   :  { %v1018_v33 = vmul.f32 0.01, %v931_v31  ;;  %v1021_v34 = vmax.f32 %v929_v27, %v1017_v30  ;;  %v3009_v27 = vld [vmem:[#allocation8 + $0x12c] ss:$16 sps:$4 sm:$0xff]   ;;  %v3010_v30 = vld [vmem:[#allocation8 + $0x2c8] ss:$16 sps:$4 sm:$0xff]  }
 0x146   :  { %v3018_v32 = vld [vmem:[#allocation8 + $0x2ac] ss:$16 sps:$4 sm:$0xff]  }
 0x147   :  { %v1022_v35 = vmax.f32 %v931_v31, %v1018_v33  ;;  %v3324_v39 = vpack.c.bf16 %v1021_v34, %v1021_v34  ;;  %v3015_v31 = vld [vmem:[#allocation8 + $0x10c] ss:$16 sps:$4 sm:$0xff]   ;;  %v3013_v33 = vld [vmem:[#allocation8 + $0x108] ss:$16 sps:$4 sm:$0xff]  }
 0x148   :  { %v3016_v34 = vld [vmem:[#allocation8 + $0x2a8] ss:$16 sps:$4 sm:$0xff]  }
 0x149   :  { %v1026_v37 = vpack.c.bf16 %v1022_v35, %v1022_v35  ;;  %v3021_v35 = vld [vmem:[#allocation8 + $0x28c] ss:$16 sps:$4 sm:$0xff]  }
 0x14b   :  { %1851 = vmatprep.mubr.bf16.mxu0 %v1026_v37 }
 0x14c   :  { %1852 = vmatmul.mubr.bf16.vlgmr.msra.gmra.mxu0 %v3324_v39 }
 0x14d   :  { %1902 = vmatpush1.bf16.msra.mxu0 %v2926_v38  ;;  %1933 = vmatprep.mubr.bf16.mxu0 %v1026_v37  ;;  %v3019_v37 = vld [vmem:[#allocation8 + $0x288] ss:$16 sps:$4 sm:$0xff]   ;;  %v3024_v38 = vld [vmem:[#allocation8 + $0x26c] ss:$16 sps:$4 sm:$0xff]  }
 0x14e   :  { %1903 = vmatprep.subr.bf16.mxu0 %v2934_v40  ;;  %v3022_v40 = vld [vmem:[#allocation8 + $0x268] ss:$16 sps:$4 sm:$0xff]  }
 0x151   :  { %1904 = vmatpush1.bf16.msra.mxu0 %v2932_v41  ;;  %v3027_v41 = vld [vmem:[#allocation8 + $0x24c] ss:$16 sps:$4 sm:$0xff]  }
 0x152   :  { %1905 = vmatprep.subr.bf16.mxu0 %v2940_v42  ;;  %v3025_v42 = vld [vmem:[#allocation8 + $0x248] ss:$16 sps:$4 sm:$0xff]  }
 0x155   :  { %1906 = vmatpush1.bf16.msra.mxu0 %v2938_v44  ;;  %v3030_v44 = vld [vmem:[#allocation8 + $0x22c] ss:$16 sps:$4 sm:$0xff]  }
 0x156   :  { %1907 = vmatprep.subr.bf16.mxu0 %v2946_v45  ;;  %v3058_v45 = vld [vmem:[#allocation10 + $0x78] sm:$0xff]  }
 0x159   :  { %1908 = vmatpush1.bf16.msra.mxu0 %v2944_v46  ;;  %v3059_v46 = vld [vmem:[#allocation10 + $0x38] sm:$0xff]  }
 0x15a   :  { %1909 = vmatprep.subr.bf16.mxu0 %v2952_v47  ;;  %v3060_v47 = vld [vmem:[#allocation10 + $0x70] sm:$0xff]  }
 0x15d   :  { %1910 = vmatpush1.bf16.msra.mxu0 %v2950_v48  ;;  %v3028_v48 = vld [vmem:[#allocation8 + $0x228] ss:$16 sps:$4 sm:$0xff]  }
 0x15e   :  { %1911 = vmatprep.subr.bf16.mxu0 %v2958_v49  ;;  %v3061_v49 = vld [vmem:[#allocation10 + $0x30] sm:$0xff]  }
 0x161   :  { %1912 = vmatpush1.bf16.msra.mxu0 %v2956_v50  ;;  %v3033_v50 = vld [vmem:[#allocation8 + $0x20c] ss:$16 sps:$4 sm:$0xff]  }
 0x162   :  { %1913 = vmatprep.subr.bf16.mxu0 %v2964_v51  ;;  %v3031_v51 = vld [vmem:[#allocation8 + $0x208] ss:$16 sps:$4 sm:$0xff]  }
 0x165   :  { %1914 = vmatpush1.bf16.msra.mxu0 %v2962_v52  ;;  %v3063_v52 = vld [vmem:[#allocation10 + $0x28] sm:$0xff]  }
 0x166   :  { %1915 = vmatprep.subr.bf16.mxu0 %v2970_v53  ;;  %v3036_v53 = vld [vmem:[#allocation8 + $0x3ec] ss:$16 sps:$4 sm:$0xff]  }
 0x169   :  { %1916 = vmatpush1.bf16.msra.mxu0 %v2968_v54  ;;  %v3064_v54 = vld [vmem:[#allocation10 + $0x60] sm:$0xff]  }
 0x16a   :  { %1917 = vmatprep.subr.bf16.mxu0 %v2976_v55  ;;  %v3034_v55 = vld [vmem:[#allocation8 + $0x3e8] ss:$16 sps:$4 sm:$0xff]  }
 0x16d   :  { %1918 = vmatpush2.bf16.msra.mxu0 %v2974_v56  ;;  %v3065_v56 = vld [vmem:[#allocation10 + $0x20] sm:$0xff]  }
 0x16e   :  { %1919 = vmatprep.subr.bf16.mxu0 %v2982_v57  ;;  %v3039_v57 = vld [vmem:[#allocation8 + $0x3cc] ss:$16 sps:$4 sm:$0xff]  }
 0x171   :  { %1920 = vmatpush2.bf16.msra.mxu0 %v2980_v59  ;;  %v3066_v59 = vld [vmem:[#allocation10 + $0x58] sm:$0xff]  }
 0x172   :  { %v1010_v2 = vpop.f32.mrf.mxu0  ;;  %1921 = vmatprep.subr.bf16.mxu0 %v2988_v61  ;;  %v3037_v61 = vld [vmem:[#allocation8 + $0x3c8] ss:$16 sps:$4 sm:$0xff]  }
 0x173   :  { %v969_v1 = vpop.f32.mrf.mxu1 }
 0x174   :  { %v970_v4 = vadd.f32 %v969_v1, %v248_v62  ;;  %v1012_v6 = vpop.f32.mrf.mxu0  ;;  %v3067_v62 = vld [vmem:[#allocation10 + $0x18] sm:$0xff]  }
 0x175   :  { %v971_v5 = vpop.f32.mrf.mxu1  ;;  %1922 = vmatpush2.bf16.msra.mxu0 %v2986_v63  ;;  %v3042_v63 = vld [vmem:[#allocation8 + $0x3ac] ss:$16 sps:$4 sm:$0xff]  }
 0x176   :  { %v1011_v7 = vadd.f32 %v1010_v2, %v970_v4  ;;  %v972_v36 = vadd.f32 %v971_v5, %v252_v0  ;;  %v1014_v11 = vpop.f32.mrf.mxu0  ;;  %1923 = vmatprep.subr.bf16.mxu0 %v2994_v3  ;;  %v3040_v0 = vld [vmem:[#allocation8 + $0x3a8] ss:$16 sps:$4 sm:$0xff]   ;;  %v3045_v1 = vld [vmem:[#allocation8 + $0x38c] ss:$16 sps:$4 sm:$0xff]  }
 0x177   :  { %v973_v10 = vpop.f32.mrf.mxu1  ;;  %v3043_v2 = vld [vmem:[#allocation8 + $0x388] ss:$16 sps:$4 sm:$0xff]   ;;  %v3048_v3 = vld [vmem:[#allocation8 + $0x36c] ss:$16 sps:$4 sm:$0xff]   ;;  %v3068_v11 = vld [vmem:[#allocation10 + $0x50] sm:$0xff]  }
 0x178   :  { %v1019_v13 = vmul.f32 0.01, %v1011_v7  ;;  %v1013_v14 = vadd.f32 %v1012_v6, %v972_v36  ;;  %v1015_v16 = vpop.f32.mrf.mxu0  ;;  %v3046_v4 = vld [vmem:[#allocation8 + $0x368] ss:$16 sps:$4 sm:$0xff]   ;;  %v3051_v5 = vld [vmem:[#allocation8 + $0x34c] ss:$16 sps:$4 sm:$0xff]  }
 0x179   :  { %v974_v15 = vpop.f32.mrf.mxu1  ;;  %1924 = vmatpush2.bf16.msra.mxu0 %v2992_v8  ;;  %v3049_v6 = vld [vmem:[#allocation8 + $0x348] ss:$16 sps:$4 sm:$0xff]   ;;  %v3057_v8 = vld [vmem:[#allocation8 + $0x30c] ss:$16 sps:$4 sm:$0xff]   ;;  %v3073_v16 = vld [vmem:[#allocation10] sm:$0xff]  }
 0x17a   :  { %v1020_v17 = vmul.f32 0.01, %v1013_v14  ;;  %v1023_v20 = vmax.f32 %v1011_v7, %v1019_v13  ;;  %1925 = vmatprep.subr.bf16.mxu0 %v3000_v12  ;;  %v3054_v7 = vld [vmem:[#allocation8 + $0x32c] ss:$16 sps:$4 sm:$0xff]   ;;  %v3052_v36 = vld [vmem:[#allocation8 + $0x328] ss:$16 sps:$4 sm:$0xff]  }
 0x17b   :  { %v3055_v10 = vld [vmem:[#allocation8 + $0x308] ss:$16 sps:$4 sm:$0xff]   ;;  %v3069_v12 = vld [vmem:[#allocation10 + $0x10] sm:$0xff]   ;;  %v3072_v15 = vld [vmem:[#allocation10 + $0x40] sm:$0xff]  }
 0x17c   :  { %v1024_v24 = vmax.f32 %v1013_v14, %v1020_v17  ;;  %v3335_v22 = vpack.c.bf16 %v1023_v20, %v1023_v20  ;;  %v3070_v13 = vld [vmem:[#allocation10 + $0x48] sm:$0xff]   ;;  %v3074_v17 = vld [vmem:[#allocation10 + $0xf8] sm:$0xff]   ;;  %v3076_v20 = vld [vmem:[#allocation10 + $0xf0] sm:$0xff]  }
 0x17d   :  { %1926 = vmatpush2.bf16.msra.mxu0 %v2998_v18  ;;  %v3071_v14 = vld [vmem:[#allocation10 + $0x8] sm:$0xff]   ;;  %v3075_v18 = vld [vmem:[#allocation10 + $0xb8] sm:$0xff]  }
 0x17e   :  { %v1028_v25 = vpack.c.bf16 %v1024_v24, %v1024_v24  ;;  %1927 = vmatprep.subr.bf16.mxu0 %v3003_v21  ;;  %v3077_v21 = vld [vmem:[#allocation10 + $0xb0] sm:$0xff]   ;;  %v3078_v24 = vld [vmem:[#allocation10 + $0xe8] sm:$0xff]  }
 0x180   :  { %1892 = vmatprep.mubr.bf16.mxu1 %v1028_v25 }
 0x181   :  { %1893 = vmatmul.mubr.bf16.vlgmr.msra.gmra.mxu1 %v3335_v22  ;;  %1928 = vmatpush2.bf16.msra.mxu0 %v3001_v26  ;;  %v3080_v26 = vld [vmem:[#allocation10 + $0xe0] sm:$0xff]  }
 0x182   :  { %1943 = vmatpush1.bf16.msra.mxu1 %v3004_v9  ;;  %1974 = vmatprep.mubr.bf16.mxu1 %v1028_v25  ;;  %v3079_v25 = vld [vmem:[#allocation10 + $0xa8] sm:$0xff]   ;;  %v3081_v9 = vld [vmem:[#allocation10 + $0xa0] sm:$0xff]  }
 0x183   :  { %1929 = vmatprep.subr.bf16.mxu0 %v3009_v27  ;;  %1944 = vmatprep.subr.bf16.mxu1 %v3012_v28  ;;  %v3083_v27 = vld [vmem:[#allocation10 + $0x98] sm:$0xff]   ;;  %v3084_v28 = vld [vmem:[#allocation10 + $0xd0] sm:$0xff]  }
 0x185   :  { %1930 = vmatpush2.bf16.msra.mxu0 %v3007_v29  ;;  %v3085_v29 = vld [vmem:[#allocation10 + $0x90] sm:$0xff]  }
 0x186   :  { %1945 = vmatpush1.bf16.msra.mxu1 %v3010_v30  ;;  %1931 = vmatprep.subr.bf16.mxu0 %v3015_v31  ;;  %v3086_v30 = vld [vmem:[#allocation10 + $0xc8] sm:$0xff]  }
 0x187   :  { %1946 = vmatprep.subr.bf16.mxu1 %v3018_v32  ;;  %v3087_v31 = vld [vmem:[#allocation10 + $0x88] sm:$0xff]   ;;  %v3088_v32 = vld [vmem:[#allocation10 + $0xc0] sm:$0xff]  }
 0x189   :  { %1932 = vmatpush2.bf16.msra.mxu0 %v3013_v33  ;;  %v3089_v33 = vld [vmem:[#allocation10 + $0x80] sm:$0xff]  }
 0x18a   :  { %1947 = vmatpush1.bf16.msra.mxu1 %v3016_v34  ;;  %2635 = vmatprep.subr.bf16.mxu0 %v3058_v45 }
 0x18b   :  { %1948 = vmatprep.subr.bf16.mxu1 %v3021_v35 }
 0x18c   :  { %1934 = vmatmul.mubr.bf16.vlgmr.msra.gmra.mxu0 %v3324_v39  ;;  %v3062_v39 = vld [vmem:[#allocation10 + $0x68] sm:$0xff]  }
 0x18d   :  { %2636 = vmatpush3.bf16.msra.mxu0 %v3059_v46 }
 0x18e   :  { %1949 = vmatpush1.bf16.msra.mxu1 %v3019_v37  ;;  %2637 = vmatprep.subr.bf16.mxu0 %v3060_v47 }
 0x18f   :  { %1950 = vmatprep.subr.bf16.mxu1 %v3024_v38 }
 0x191   :  { %2638 = vmatpush3.bf16.msra.mxu0 %v3061_v49 }
 0x192   :  { %1951 = vmatpush1.bf16.msra.mxu1 %v3022_v40  ;;  %2639 = vmatprep.subr.bf16.mxu0 %v3062_v39  ;;  %v1157_v40 = vld [vmem:[%s3361_s4] sm:$0xf] }
 0x193   :  { %1952 = vmatprep.subr.bf16.mxu1 %v3027_v41  ;;  %v1162_v41 = vrot.slane %v1157_v40, %v239_v19 }
 0x195   :  { %2640 = vmatpush3.bf16.msra.mxu0 %v3063_v52 }
 0x196   :  { %1953 = vmatpush1.bf16.msra.mxu1 %v3025_v42  ;;  %2641 = vmatprep.subr.bf16.mxu0 %v3064_v54  ;;  %v1166_v42 = vrot.slane %v1157_v40, %v243_v23 }
 0x197   :  { %1954 = vmatprep.subr.bf16.mxu1 %v3030_v44 }
 0x199   :  { %2642 = vmatpush3.bf16.msra.mxu0 %v3065_v56 }
 0x19a   :  { %1955 = vmatpush1.bf16.msra.mxu1 %v3028_v48  ;;  %2643 = vmatprep.subr.bf16.mxu0 %v3066_v59 }
 0x19b   :  { %1956 = vmatprep.subr.bf16.mxu1 %v3033_v50 }
 0x19d   :  { %2644 = vmatpush3.bf16.msra.mxu0 %v3067_v62  ;;  %v1174_v62 = vrot.slane %v1157_v40, %v251_v60 }
 0x19e   :  { %1957 = vmatpush1.bf16.msra.mxu1 %v3031_v51  ;;  %2645 = vmatprep.subr.bf16.mxu0 %v3068_v11 }
 0x19f   :  { %1958 = vmatprep.subr.bf16.mxu1 %v3036_v53 }
 0x1a1   :  { %2646 = vmatpush3.bf16.msra.mxu0 %v3069_v12 }
 0x1a2   :  { %1959 = vmatpush2.bf16.msra.mxu1 %v3034_v55  ;;  %2647 = vmatprep.subr.bf16.mxu0 %v3070_v13 }
 0x1a3   :  { %1960 = vmatprep.subr.bf16.mxu1 %v3039_v57 }
 0x1a5   :  { %2648 = vmatpush3.bf16.msra.mxu0 %v3071_v14 }
 0x1a6   :  { %1961 = vmatpush2.bf16.msra.mxu1 %v3037_v61  ;;  %2649 = vmatprep.subr.bf16.mxu0 %v3072_v15  ;;  %v1170_v61 = vrot.slane %v1157_v40, %v247_v58  ;;  %v2602_v15 = vld [vmem:[%s3363_s6] ss:$0 sm:$0xff] }
 0x1a7   :  { %1962 = vmatprep.subr.bf16.mxu1 %v3042_v63 }
 0x1a9   :  { %2650 = vmatpush3.bf16.msra.mxu0 %v3073_v16 }
 0x1aa   :  { %1963 = vmatpush2.bf16.msra.mxu1 %v3040_v0 }
 0x1ab   :  { %1964 = vmatprep.subr.bf16.mxu1 %v3045_v1 }
 0x1ae   :  { %1965 = vmatpush2.bf16.msra.mxu1 %v3043_v2 }
 0x1af   :  { %1966 = vmatprep.subr.bf16.mxu1 %v3048_v3 }
 0x1b2   :  { %1967 = vmatpush2.bf16.msra.mxu1 %v3046_v4 }
 0x1b3   :  { %1968 = vmatprep.subr.bf16.mxu1 %v3051_v5 }
 0x1b6   :  { %1969 = vmatpush2.bf16.msra.mxu1 %v3049_v6 }
 0x1b7   :  { %1970 = vmatprep.subr.bf16.mxu1 %v3054_v7 }
 0x1ba   :  { %1971 = vmatpush2.bf16.msra.mxu1 %v3052_v36 }
 0x1bb   :  { %1972 = vmatprep.subr.bf16.mxu1 %v3057_v8 }
 0x1be   :  { %1973 = vmatpush2.bf16.msra.mxu1 %v3055_v10 }
 0x1bf   :  { %2657 = vmatprep.subr.bf16.mxu1 %v3074_v17 }
 0x1c1   :  { %1975 = vmatmul.mubr.bf16.vlgmr.msra.gmra.mxu1 %v3335_v22  ;;  %v3082_v22 = vld [vmem:[#allocation10 + $0xd8] sm:$0xff]  }
 0x1c2   :  { %2658 = vmatpush3.bf16.msra.mxu1 %v3075_v18 }
 0x1c3   :  { %2659 = vmatprep.subr.bf16.mxu1 %v3076_v20 }
 0x1c6   :  { %2660 = vmatpush3.bf16.msra.mxu1 %v3077_v21 }
 0x1c7   :  { %2661 = vmatprep.subr.bf16.mxu1 %v3078_v24 }
 0x1ca   :  { %2662 = vmatpush3.bf16.msra.mxu1 %v3079_v25 }
 0x1cb   :  { %2663 = vmatprep.subr.bf16.mxu1 %v3080_v26 }
 0x1ce   :  { %2664 = vmatpush3.bf16.msra.mxu1 %v3081_v9 }
 0x1cf   :  { %2665 = vmatprep.subr.bf16.mxu1 %v3082_v22 }
 0x1d2   :  { %2666 = vmatpush3.bf16.msra.mxu1 %v3083_v27 }
 0x1d3   :  { %2667 = vmatprep.subr.bf16.mxu1 %v3084_v28 }
 0x1d6   :  { %2668 = vmatpush3.bf16.msra.mxu1 %v3085_v29 }
 0x1d7   :  { %2669 = vmatprep.subr.bf16.mxu1 %v3086_v30 }
 0x1da   :  { %2670 = vmatpush3.bf16.msra.mxu1 %v3087_v31 }
 0x1db   :  { %2671 = vmatprep.subr.bf16.mxu1 %v3088_v32 }
 0x1de   :  { %2672 = vmatpush3.bf16.msra.mxu1 %v3089_v33 }
 0x20c   :  { %v1853_v34 = vpop.f32.mrf.mxu0 }
 0x20d   :  { %v1854_v44 = vadd.f32 %v1853_v34, %v1162_v41 }
 0x20e   :  { %v1855_v35 = vpop.f32.mrf.mxu0 }
 0x20f   :  { %v1856_v46 = vadd.f32 %v1855_v35, %v1166_v42 }
 0x210   :  { %v1857_v37 = vpop.f32.mrf.mxu0 }
 0x212   :  { %v1858_v38 = vpop.f32.mrf.mxu0 }
 0x241   :  { %v1894_v45 = vpop.f32.mrf.mxu1 }
 0x242   :  { %v1895_v47 = vadd.f32 %v1894_v45, %v1854_v44 }
 0x243   :  { %v1896_v48 = vpop.f32.mrf.mxu1 }
 0x244   :  { %v1983_v49 = vmul.f32 0.01, %v1895_v47  ;;  %v1897_v50 = vadd.f32 %v1896_v48, %v1856_v46 }
 0x245   :  { %v1898_v39 = vpop.f32.mrf.mxu1 }
 0x246   :  { %v1984_v51 = vmul.f32 0.01, %v1897_v50  ;;  %v1987_v52 = vmax.f32 %v1895_v47, %v1983_v49 }
 0x247   :  { %v1899_v53 = vpop.f32.mrf.mxu1 }
 0x248   :  { %v1988_v54 = vmax.f32 %v1897_v50, %v1984_v51  ;;  %v1991_v56 = vpack.c.bf16 %v1987_v52, %v1987_v52 }
 0x24a   :  { %v1992_v55 = vpack.c.bf16 %v1988_v54, %v1988_v54 }
 0x24c   :  { %2290 = vmatprep.mubr.bf16.mxu0 %v1992_v55  ;;  %v1935_v57 = vpop.f32.mrf.mxu0 }
 0x24d   :  { %2291 = vmatmul.mubr.bf16.vlgmr.msra.gmra.mxu0 %v1991_v56  ;;  %v1936_v63 = vadd.f32 %v1935_v57, %v1170_v61 }
 0x24e   :  { %v1937_v19 = vpop.f32.mrf.mxu0 }
 0x24f   :  { %v1938_v1 = vadd.f32 %v1937_v19, %v1174_v62 }
 0x250   :  { %v1939_v59 = vpop.f32.mrf.mxu0 }
 0x252   :  { %v1940_v23 = vpop.f32.mrf.mxu0 }
 0x281   :  { %v1976_v0 = vpop.f32.mrf.mxu1 }
 0x282   :  { %v1977_v2 = vadd.f32 %v1976_v0, %v1936_v63 }
 0x283   :  { %v1978_v3 = vpop.f32.mrf.mxu1 }
 0x284   :  { %v1985_v4 = vmul.f32 0.01, %v1977_v2  ;;  %v1979_v5 = vadd.f32 %v1978_v3, %v1938_v1 }
 0x285   :  { %v1980_v6 = vpop.f32.mrf.mxu1 }
 0x286   :  { %v1986_v7 = vmul.f32 0.01, %v1979_v5  ;;  %v1989_v36 = vmax.f32 %v1977_v2, %v1985_v4 }
 0x287   :  { %v1981_v8 = vpop.f32.mrf.mxu1 }
 0x288   :  { %v1990_v10 = vmax.f32 %v1979_v5, %v1986_v7  ;;  %v1993_v12 = vpack.c.bf16 %v1989_v36, %v1989_v36 }
 0x28a   :  { %v1994_v11 = vpack.c.bf16 %v1990_v10, %v1990_v10 }
 0x28c   :  { %2330 = vmatprep.mubr.bf16.mxu1 %v1994_v11 }
 0x28d   :  { %2331 = vmatmul.mubr.bf16.vlgmr.msra.gmra.mxu1 %v1993_v12 }
 0x30d   :  { %v2651_v58 = vpop.f32.mrf.mxu0 }
 0x30f   :  { %v2652_v13 = vpop.f32.mrf.mxu0 }
 0x310   :  { %v2653_v14 = vadd.f32 %v2652_v13, %v2651_v58 }
 0x311   :  { %v2654_v43 = vpop.f32.mrf.mxu0 }
 0x312   :  { %v2293_v18 = vadd.f32 %v2653_v14, %v2602_v15 }
 0x313   :  { %v2655_v60 = vpop.f32.mrf.mxu0 }
 0x34d   :  { %v2673_v16 = vpop.f32.mrf.mxu1 }
 0x34f   :  { %v2674_v17 = vpop.f32.mrf.mxu1 }
 0x350   :  { %v2675_v20 = vadd.f32 %v2674_v17, %v2673_v16 }
 0x351   :  { %v2676_v21 = vpop.f32.mrf.mxu1 }
 0x352   :  { %v2333_v24 = vadd.f32 %v2675_v20, %v2293_v18 }
 0x353   :  { %v2677_v25 = vpop.f32.mrf.mxu1 }
 0x354   :  { %2338 = vst [vmem:[#allocation11] sm:$0x3] %v2333_v24 }
 0x355   :  { %3201 = shalt.err (!%p3198_p1)
}
 0x356   :  { %2348 = dma.vmem_to_hbm [thread:$0]  %s2346_s29, 32, %s3364_s7, [#allocation4]  }
 0x357   :  { %3216 = dma.done.wait [#allocation4], 32  }
 0x358   :  { %3217 = vsyncadd [#allocation4], 4294967264 }
 0x359   :  { %2352 = vsyncpa [#allocation3], 1 }
 0x35a   :  { %2353 = vsyncpa [#allocation6], 1 }
 0x35b   :  { %2354 = vsyncpa [#allocation9], 1 }
 0x35c   :  { %2355 = vsyncpa [#allocation4], 1 }

</bundles_post_ra>
